<compile_context>
chip_gen: v7x
topology: tpu7x:2x2x1
jax: 0.10.0
libtpu: 0.0.40
codegen_flags: <defaults>
</compile_context>

<pallas_src>
import functools
import math

import jax
import jax.numpy as jnp
from jax.experimental import pallas as pl
from jax.experimental.pallas import tpu as pltpu

_LANE = 128
_SUBLANE = 8


def _round_up(n, m):
    return -(-n // m) * m


def _mse_sum_kernel(x_ref, t_ref, out_ref, acc_ref, *, tile_rows, valid_rows,
                    n_inner, needs_mask):
    c = pl.program_id(0)   # TensorCore shard ("parallel")
    i = pl.program_id(1)   # reduction step  ("arbitrary")

    @pl.when(i == 0)
    def _init():
        acc_ref[...] = jnp.zeros_like(acc_ref)

    x = x_ref[...].astype(jnp.float32)
    t = t_ref[...].astype(jnp.float32)
    d = x - t
    sq = d * d

    if needs_mask:
        # Global row id for every element of this tile. This masks both the ragged
        # last row-tile AND any fully-out-of-range tiles of the second core (whose
        # block index was clamped in the index_map). Applied BEFORE accumulation so
        # NaN/Inf garbage from the padded region cannot leak in.
        tile_idx = c * n_inner + i
        row_ids = tile_idx * tile_rows + jax.lax.broadcasted_iota(
            jnp.int32, sq.shape, 0)
        sq = jnp.where(row_ids < valid_rows, sq, 0.0)

    # Fold (tile_rows, 128) -> (8, 128): pure elementwise VPU adds, no cross-lane
    # XLU work inside the pipelined loop.
    acc_ref[...] += jnp.sum(
        sq.reshape(tile_rows // _SUBLANE, _SUBLANE, _LANE), axis=0)

    @pl.when(i == pl.num_programs(1) - 1)
    def _finalize():
        # Single cross-lane reduce, once per core; each core writes its own partial.
        out_ref[0, 0] = jnp.sum(acc_ref[...])


def content_loss(x, target, *, tile_rows=None, min_kernel_elems=32768):
    """ContentLoss.forward: returns (input_passthrough, mse_loss(input, target))."""
    assert x.shape == target.shape, (x.shape, target.shape)
    assert x.dtype == target.dtype, (x.dtype, target.dtype)
    total = math.prod(x.shape)
    itemsize = jnp.dtype(x.dtype).itemsize

    # Tiny feature maps: fixed pallas_call overhead dominates -> plain jnp fast path.
    if total < max(min_kernel_elems, _SUBLANE * _LANE):
        diff = x.astype(jnp.float32) - target.astype(jnp.float32)
        return x, jnp.mean(diff * diff)

    if tile_rows is None:
        # Defaults keep the double-buffered working set (2 inputs x 2 buffers) at
        # ~16 MiB -- large enough to amortize per-step overhead, small enough for
        # every generation's physical VMEM (limit raised explicitly below).
        tile_rows = 16384 if itemsize <= 2 else 8192

    rows = total // _LANE          # full lane-dense rows
    main = rows * _LANE            # 128-aligned prefix handled by the kernel
    tail = total - main            # < 128 leftover elements (rare for conv maps)

    xf = x.reshape(-1)             # layout bitcast for contiguous default layouts
    tf = target.reshape(-1)
    if tail:
        # TODO(synk): non-128-divisible element counts pay one prefix-slice copy;
        # conv feature maps (C*H*W a multiple of 128) never take this branch.
        x_main = jax.lax.slice(xf, (0,), (main,))
        t_main = jax.lax.slice(tf, (0,), (main,))
    else:
        x_main, t_main = xf, tf
    x2 = x_main.reshape(rows, _LANE)
    t2 = t_main.reshape(rows, _LANE)

    tr = min(tile_rows, _round_up(rows, _SUBLANE))
    tr = _round_up(tr, _SUBLANE)
    n_tiles = pl.cdiv(rows, tr)
    # Leading "parallel" axis: shards row-tiles across the 2 TensorCores on v7x;
    # on 1-TC chips it is just one extra (negligible) sequential grid step.
    num_cores = 2 if n_tiles >= 2 else 1
    n_inner = pl.cdiv(n_tiles, num_cores)
    needs_mask = (num_cores * n_inner * tr) != rows

    kernel = functools.partial(
        _mse_sum_kernel, tile_rows=tr, valid_rows=rows, n_inner=n_inner,
        needs_mask=needs_mask)

    def in_map(c, i):
        # Clamp so the DMA never walks past the array; tiles whose true index is
        # out of range are fully zero-masked inside the kernel.
        return (jnp.minimum(c * n_inner + i, n_tiles - 1), 0)

    working_set = 2 * 2 * tr * _LANE * itemsize   # 2 inputs x double buffer

    partials = pl.pallas_call(
        kernel,
        out_shape=jax.ShapeDtypeStruct((num_cores, 1), jnp.float32),
        grid_spec=pltpu.PrefetchScalarGridSpec(
            num_scalar_prefetch=0,
            grid=(num_cores, n_inner),
            in_specs=[
                pl.BlockSpec((tr, _LANE), in_map),
                pl.BlockSpec((tr, _LANE), in_map),
            ],
            out_specs=pl.BlockSpec((1, 1), lambda c, i: (c, 0),
                                   memory_space=pltpu.SMEM),
            scratch_shapes=[pltpu.VMEM((_SUBLANE, _LANE), jnp.float32)],
        ),
        compiler_params=pltpu.CompilerParams(
            dimension_semantics=("parallel", "arbitrary"),
            vmem_limit_bytes=int(working_set + (4 << 20)),
        ),
        cost_estimate=pl.CostEstimate(
            flops=3 * main,
            transcendentals=0,
            bytes_accessed=2 * main * itemsize + num_cores * 4,
        ),
    )(x2, t2)

    sq_sum = jnp.sum(partials)
    if tail:
        xt = jax.lax.slice(xf, (main,), (total,)).astype(jnp.float32)
        tt = jax.lax.slice(tf, (main,), (total,)).astype(jnp.float32)
        sq_sum = sq_sum + jnp.sum((xt - tt) ** 2)

    # ContentLoss.forward returns its input unchanged -- no kernel writeback needed.
    return x, sq_sum / float(total)


if __name__ == "__main__":
    root = jax.random.PRNGKey(0)

    def run_case(key, shape, dtype, **kw):
        k1, k2 = jax.random.split(key)
        x = jax.random.normal(k1, shape, dtype=jnp.float32).astype(dtype)
        t = jax.random.normal(k2, shape, dtype=jnp.float32).astype(dtype)
        out, loss = content_loss(x, t, **kw)
        out = jax.block_until_ready(out)
        loss = jax.block_until_ready(loss)
        ref = jnp.mean((x.astype(jnp.float32) - t.astype(jnp.float32)) ** 2)
        assert jnp.allclose(loss, ref, rtol=1e-5, atol=1e-6), (shape, dtype, loss, ref)
        assert out.shape == x.shape and out.dtype == x.dtype
        assert jnp.array_equal(out, x)

    keys = jax.random.split(root, 6)
    # Aligned conv-feature-map-like input -> main kernel path.
    run_case(keys[0], (2, 8, 64, 64), jnp.float32)
    # bf16 inputs in HBM (half the traffic), f32 accumulation in-kernel.
    run_case(keys[1], (2, 8, 64, 64), jnp.bfloat16)
    # Ragged last tile + 2-core split with in-kernel masking (no jnp.pad).
    run_case(keys[2], (2, 8, 64, 64), jnp.float32, tile_rows=384)
    # Multi-step accumulation over the "arbitrary" reduction axis.
    run_case(keys[3], (2, 8, 64, 64), jnp.float32, tile_rows=128)
    # Non-128-divisible element count: aligned prefix in-kernel + tiny jnp tail.
    run_case(keys[4], (5, 13, 29, 31), jnp.float32)
    # Tiny early-layer feature map -> plain-jnp fast path (no kernel launch).
    run_case(keys[5], (2, 4, 16, 16), jnp.float32)

    print("KERNEL_OK")
</pallas_src>

<mosaic_0001>
module attributes {stable_mosaic.version = 11 : i64} {
  func.func @_mse_sum_kernel(%arg0: i32, %arg1: i32, %arg2: memref<512x128xf32, #tpu.memory_space<vmem>>, %arg3: memref<512x128xf32, #tpu.memory_space<vmem>>, %arg4: memref<1x1xf32, #tpu.memory_space<smem>>, %arg5: memref<8x128xf32, #tpu.memory_space<vmem>>) attributes {dimension_semantics = [#tpu.dimension_semantics<parallel>, #tpu.dimension_semantics<arbitrary>], iteration_bounds = array<i64: 1, 1>, scalar_prefetch = 0 : i64, scratch_operands = 1 : i64, tpu.core_type = #tpu.core_type<tc>, window_params = [{transform_indices = @transform_0, window_bounds = array<i64: 512, 128>}, {transform_indices = @transform_1, window_bounds = array<i64: 512, 128>}, {transform_indices = @transform_2, window_bounds = array<i64: 1, 1>}]} {
    %c0_i32 = arith.constant 0 : i32
    %0 = arith.cmpi eq, %arg1, %c0_i32 : i32
    %1 = arith.extui %0 : i1 to i32
    %c0_i32_0 = arith.constant 0 : i32
    %2 = arith.cmpi ne, %1, %c0_i32_0 : i32
    scf.if %2 {
      %cst_10 = arith.constant 0.000000e+00 : f32
      %15 = vector.broadcast %cst_10 : f32 to vector<8x128xf32>
      %c0_11 = arith.constant 0 : index
      %c0_12 = arith.constant 0 : index
      %16 = vector.load %arg5[%c0_11, %c0_12] : memref<8x128xf32, #tpu.memory_space<vmem>>, vector<8x128xf32>
      tpu.vector_store %arg5[%c0_11, %c0_12], %15 {strides = array<i32>} : memref<8x128xf32, #tpu.memory_space<vmem>>, vector<8x128xf32>,
    } else {
    }
    %c0 = arith.constant 0 : index
    %c0_1 = arith.constant 0 : index
    %3 = vector.load %arg2[%c0, %c0_1] : memref<512x128xf32, #tpu.memory_space<vmem>>, vector<512x128xf32>
    %c0_2 = arith.constant 0 : index
    %c0_3 = arith.constant 0 : index
    %4 = vector.load %arg3[%c0_2, %c0_3] : memref<512x128xf32, #tpu.memory_space<vmem>>, vector<512x128xf32>
    %5 = arith.subf %3, %4 : vector<512x128xf32>
    %6 = arith.mulf %5, %5 : vector<512x128xf32>
    %c0_4 = arith.constant 0 : index
    %c0_5 = arith.constant 0 : index
    %7 = vector.load %arg5[%c0_4, %c0_5] : memref<8x128xf32, #tpu.memory_space<vmem>>, vector<8x128xf32>
    %8 = vector.shape_cast %6 : vector<512x128xf32> to vector<64x8x128xf32>
    %cst = arith.constant dense<0.000000e+00> : vector<8x128xf32>
    %9 = vector.multi_reduction <add>, %8, %cst [0] : vector<64x8x128xf32> to vector<8x128xf32>
    %10 = arith.addf %7, %9 : vector<8x128xf32>
    %c0_6 = arith.constant 0 : index
    %c0_7 = arith.constant 0 : index
    %11 = vector.load %arg5[%c0_6, %c0_7] : memref<8x128xf32, #tpu.memory_space<vmem>>, vector<8x128xf32>
    tpu.vector_store %arg5[%c0_6, %c0_7], %10 {strides = array<i32>} : memref<8x128xf32, #tpu.memory_space<vmem>>, vector<8x128xf32>,
    %c0_i32_8 = arith.constant 0 : i32
    %12 = arith.cmpi eq, %arg1, %c0_i32_8 : i32
    %13 = arith.extui %12 : i1 to i32
    %c0_i32_9 = arith.constant 0 : i32
    %14 = arith.cmpi ne, %13, %c0_i32_9 : i32
    scf.if %14 {
      %c0_10 = arith.constant 0 : index
      %c0_11 = arith.constant 0 : index
      %15 = vector.load %arg5[%c0_10, %c0_11] : memref<8x128xf32, #tpu.memory_space<vmem>>, vector<8x128xf32>
      %16 = vector.shape_cast %15 : vector<8x128xf32> to vector<1x8x128xf32>
      %cst_12 = arith.constant dense<0.000000e+00> : vector<1xf32>
      %17 = vector.multi_reduction <add>, %16, %cst_12 [1, 2] : vector<1x8x128xf32> to vector<1xf32>
      %18 = vector.shape_cast %17 : vector<1xf32> to vector<1x1x1xf32>
      %19 = vector.extract %18[0, 0, 0] : f32 from vector<1x1x1xf32>
      %c0_13 = arith.constant 0 : index
      %c0_14 = arith.constant 0 : index
      %20 = memref.load %arg4[%c0_13, %c0_14] : memref<1x1xf32, #tpu.memory_space<smem>>
      memref.store %19, %arg4[%c0_13, %c0_14] : memref<1x1xf32, #tpu.memory_space<smem>>
    } else {
    }
    return
  }
  func.func @transform_0(%arg0: i32, %arg1: i32) -> (i32, i32) {
    %c1_i32 = arith.constant 1 : i32
    %0 = arith.muli %arg0, %c1_i32 : i32
    %1 = arith.addi %0, %arg1 : i32
    %c0_i32 = arith.constant 0 : i32
    %2 = arith.minsi %1, %c0_i32 : i32
    %c0_i32_0 = arith.constant 0 : i32
    %c0_i32_1 = arith.constant 0 : i32
    return %2, %c0_i32_0 : i32, i32
  }
  func.func @transform_1(%arg0: i32, %arg1: i32) -> (i32, i32) {
    %c1_i32 = arith.constant 1 : i32
    %0 = arith.muli %arg0, %c1_i32 : i32
    %1 = arith.addi %0, %arg1 : i32
    %c0_i32 = arith.constant 0 : i32
    %2 = arith.minsi %1, %c0_i32 : i32
    %c0_i32_0 = arith.constant 0 : i32
    %c0_i32_1 = arith.constant 0 : i32
    return %2, %c0_i32_0 : i32, i32
  }
  func.func @transform_2(%arg0: i32, %arg1: i32) -> (i32, i32) {
    %c0_i32 = arith.constant 0 : i32
    %c0_i32_0 = arith.constant 0 : i32
    return %arg0, %c0_i32 : i32, i32
  }
}

</mosaic_0001>

<bundles_post_ra>
// kernel: tpu_custom_call.1
= control target key start
LH: loop header
LB: loop body
LE: loop exit
PB: predicated region body
PF: predicated region fallthrough
CT: control target
= control target key end

     0   :  { %7 = vsyncpa [#allocation4], 0  ;;  %s544_s0 = inlined_call_operand.hbm [shape: f32[512,128], index: 0, kind: input, shape index: {}]   ;;  %s545_s1 = inlined_call_operand.hbm [shape: f32[512,128], index: 1, kind: input, shape index: {}]   ;;  %s546_s2 = inlined_call_operand.hbm [shape: f32[1,1], index: 2, kind: output, shape index: {}]  }
   0x1   :  { %8 = vsyncpa [#allocation7], 0 }
   0x2   :  { %9 = vsyncpa [#allocation5], 0  ;;  %s488_s9 = smov [#allocation3]   ;;  %s428_s13 = scalar_lea.hbm %s544_s0, 8192 }
   0x3   :  { %s21_s10 = sshll.u32 %s488_s9, 4  ;;  %p429_p0 = scmp.ne.s32.totalorder %s544_s0, %s428_s13  ;;  %s22_s10 = int_to_ptr.vmem [resolvable:$true] %s21_s10 }
   0x4   :  { %p432_p1 = scmp.lt.u32.totalorder %s428_s13, %s544_s0 }
   0x6   :  { %p434_p2 = pnand %p432_p1, %p429_p0 }
   0x8   :  { %437 = shalt.err (!%p434_p2)
}
   0x9   :  { %s438_s18 = scalar_lea.vmem %s22_s10, 8192  ;;  %p443_p4 = scmp.lt.s32.totalorder %s22_s10, %s22_s10 }
   0xa   :  { %p439_p3 = scmp.ne.s32.totalorder %s22_s10, %s438_s18  ;;  %p444_p5 = scmp.lt.s32.totalorder %s438_s18, %s438_s18 }
   0xc   :  { %p445_p6 = por %p444_p5, %p443_p4 }
   0xe   :  { %p446_p7 = pnand %p445_p6, %p439_p3 }
  0x10   :  { %449 = shalt.err (!%p446_p7)
}
  0x11   :  { %s489_s19 = smov 128   ;;  %s490_s20 = smov 8  }
  0x12   :  { %27 = dma.hbm_to_vmem [thread:$0]  %s544_s0, 8192, %s22_s10, [#allocation4], %s489_s19, %s489_s19, %s490_s20  }
  0x13   :  { %s491_s23 = smov [#allocation6]   ;;  %s450_s27 = scalar_lea.hbm %s545_s1, 8192 }
  0x14   :  { %s39_s24 = sshll.u32 %s491_s23, 4  ;;  %p451_p8 = scmp.ne.s32.totalorder %s545_s1, %s450_s27  ;;  %s40_s24 = int_to_ptr.vmem [resolvable:$true] %s39_s24 }
  0x15   :  { %p454_p9 = scmp.lt.u32.totalorder %s450_s27, %s545_s1 }
  0x17   :  { %p456_p10 = pnand %p454_p9, %p451_p8 }
  0x19   :  { %459 = shalt.err (!%p456_p10)
}
  0x1a   :  { %s460_s4 = scalar_lea.vmem %s40_s24, 8192  ;;  %p465_p12 = scmp.lt.s32.totalorder %s40_s24, %s40_s24 }
  0x1b   :  { %p461_p11 = scmp.ne.s32.totalorder %s40_s24, %s460_s4  ;;  %p466_p13 = scmp.lt.s32.totalorder %s460_s4, %s460_s4 }
  0x1d   :  { %p467_p0 = por %p466_p13, %p465_p12 }
  0x1f   :  { %p468_p1 = pnand %p467_p0, %p461_p11 }
  0x21   :  { %471 = shalt.err (!%p468_p1)
}
  0x22   :  { %45 = dma.hbm_to_vmem [thread:$0]  %s545_s1, 8192, %s40_s24, [#allocation7], %s489_s19, %s489_s19, %s490_s20  }
  0x23   :  { %482 = dma.done.wait [#allocation4], 8192  }
  0x24   :  { %483 = vsyncadd [#allocation4], 4294959104 }
  0x25   :  { %484 = dma.done.wait [#allocation7], 8192  }
  0x26   :  { %485 = vsyncadd [#allocation7], 4294959104  ;;  %v65_v0 = vld [vmem:[#allocation3] sm:$0xff]  ;;  %v66_v1 = vld [vmem:[#allocation3 + $0x8] sm:$0xff]  ;;  %s472_s8 = scalar_lea.hbm %s546_s2, 16 }
  0x27   :  { %v129_v2 = vld [vmem:[#allocation6] sm:$0xff]  ;;  %v130_v3 = vld [vmem:[#allocation6 + $0x8] sm:$0xff]  ;;  %v67_v4 = vld [vmem:[#allocation3 + $0x10] sm:$0xff]  ;;  %p473_p2 = scmp.ne.s32.totalorder %s546_s2, %s472_s8  ;;  %p476_p3 = scmp.lt.u32.totalorder %s472_s8, %s546_s2 }
  0x28   :  { %v131_v5 = vld [vmem:[#allocation6 + $0x10] sm:$0xff]  ;;  %v193_v6 = vsub.f32 %v65_v0, %v129_v2  ;;  %v194_v7 = vsub.f32 %v66_v1, %v130_v3  ;;  %v68_v8 = vld [vmem:[#allocation3 + $0x18] sm:$0xff]  ;;  %v69_v11 = vld [vmem:[#allocation3 + $0x20] sm:$0xff] }
  0x29   :  { %v132_v9 = vld [vmem:[#allocation6 + $0x18] sm:$0xff]  ;;  %v195_v10 = vsub.f32 %v67_v4, %v131_v5  ;;  %v133_v12 = vld [vmem:[#allocation6 + $0x20] sm:$0xff]  ;;  %v70_v16 = vld [vmem:[#allocation3 + $0x28] sm:$0xff]  ;;  %p478_p4 = pnand %p476_p3, %p473_p2 }
  0x2a   :  { %v196_v13 = vsub.f32 %v68_v8, %v132_v9  ;;  %v257_v14 = vmul.f32 %v193_v6, %v193_v6  ;;  %v258_v15 = vmul.f32 %v194_v7, %v194_v7  ;;  %v134_v17 = vld [vmem:[#allocation6 + $0x28] sm:$0xff]  ;;  %v197_v18 = vsub.f32 %v69_v11, %v133_v12  ;;  %v71_v20 = vld [vmem:[#allocation3 + $0x30] sm:$0xff]  ;;  %v72_v25 = vld [vmem:[#allocation3 + $0x38] sm:$0xff] }
  0x2b   :  { %v259_v19 = vmul.f32 %v195_v10, %v195_v10  ;;  %v135_v21 = vld [vmem:[#allocation6 + $0x30] sm:$0xff]  ;;  %v198_v22 = vsub.f32 %v70_v16, %v134_v17  ;;  %v136_v26 = vld [vmem:[#allocation6 + $0x38] sm:$0xff]  ;;  %v73_v30 = vld [vmem:[#allocation3 + $0x40] sm:$0xff] }
  0x2c   :  { %v260_v23 = vmul.f32 %v196_v13, %v196_v13  ;;  %v322_v24 = vadd.f32 %v258_v15, %v257_v14  ;;  %v199_v27 = vsub.f32 %v71_v20, %v135_v21  ;;  %v261_v28 = vmul.f32 %v197_v18, %v197_v18  ;;  %v137_v31 = vld [vmem:[#allocation6 + $0x40] sm:$0xff]  ;;  %v74_v35 = vld [vmem:[#allocation3 + $0x48] sm:$0xff]  ;;  %v75_v40 = vld [vmem:[#allocation3 + $0x50] sm:$0xff] }
  0x2d   :  { %v200_v32 = vsub.f32 %v72_v25, %v136_v26  ;;  %v262_v33 = vmul.f32 %v198_v22, %v198_v22  ;;  %v138_v36 = vld [vmem:[#allocation6 + $0x48] sm:$0xff]  ;;  %v201_v37 = vsub.f32 %v73_v30, %v137_v31  ;;  %v139_v41 = vld [vmem:[#allocation6 + $0x50] sm:$0xff]  ;;  %v76_v45 = vld [vmem:[#allocation3 + $0x58] sm:$0xff] }
  0x2e   :  { %v323_v29 = vadd.f32 %v322_v24, %v259_v19  ;;  %v263_v38 = vmul.f32 %v199_v27, %v199_v27  ;;  %v202_v42 = vsub.f32 %v74_v35, %v138_v36  ;;  %v140_v46 = vld [vmem:[#allocation6 + $0x58] sm:$0xff]  ;;  %v203_v47 = vsub.f32 %v75_v40, %v139_v41  ;;  %v77_v50 = vld [vmem:[#allocation3 + $0x60] sm:$0xff]  ;;  %v78_v55 = vld [vmem:[#allocation3 + $0x68] sm:$0xff] }
  0x2f   :  { %v264_v43 = vmul.f32 %v200_v32, %v200_v32  ;;  %v265_v48 = vmul.f32 %v201_v37, %v201_v37  ;;  %v141_v51 = vld [vmem:[#allocation6 + $0x60] sm:$0xff]  ;;  %v204_v52 = vsub.f32 %v76_v45, %v140_v46  ;;  %v142_v56 = vld [vmem:[#allocation6 + $0x68] sm:$0xff]  ;;  %v79_v60 = vld [vmem:[#allocation3 + $0x70] sm:$0xff] }
  0x30   :  { %v324_v34 = vadd.f32 %v323_v29, %v260_v23  ;;  %v266_v53 = vmul.f32 %v202_v42, %v202_v42  ;;  %v205_v57 = vsub.f32 %v77_v50, %v141_v51  ;;  %v267_v58 = vmul.f32 %v203_v47, %v203_v47  ;;  %v143_v61 = vld [vmem:[#allocation6 + $0x70] sm:$0xff]  ;;  %v80_v1 = vld [vmem:[#allocation3 + $0x78] sm:$0xff]  ;;  %v81_v6 = vld [vmem:[#allocation3 + $0x80] sm:$0xff] }
  0x31   :  { %v206_v62 = vsub.f32 %v78_v55, %v142_v56  ;;  %v268_v63 = vmul.f32 %v204_v52, %v204_v52  ;;  %v144_v2 = vld [vmem:[#allocation6 + $0x78] sm:$0xff]  ;;  %v207_v3 = vsub.f32 %v79_v60, %v143_v61  ;;  %v145_v7 = vld [vmem:[#allocation6 + $0x80] sm:$0xff]  ;;  %v82_v11 = vld [vmem:[#allocation3 + $0x88] sm:$0xff] }
  0x32   :  { %v325_v39 = vadd.f32 %v324_v34, %v261_v28  ;;  %v269_v4 = vmul.f32 %v205_v57, %v205_v57  ;;  %v208_v8 = vsub.f32 %v80_v1, %v144_v2  ;;  %v146_v12 = vld [vmem:[#allocation6 + $0x88] sm:$0xff]  ;;  %v209_v13 = vsub.f32 %v81_v6, %v145_v7  ;;  %v83_v16 = vld [vmem:[#allocation3 + $0x90] sm:$0xff]  ;;  %v84_v21 = vld [vmem:[#allocation3 + $0x98] sm:$0xff] }
  0x33   :  { %v270_v9 = vmul.f32 %v206_v62, %v206_v62  ;;  %v271_v14 = vmul.f32 %v207_v3, %v207_v3  ;;  %v147_v17 = vld [vmem:[#allocation6 + $0x90] sm:$0xff]  ;;  %v210_v18 = vsub.f32 %v82_v11, %v146_v12  ;;  %v148_v22 = vld [vmem:[#allocation6 + $0x98] sm:$0xff]  ;;  %v85_v26 = vld [vmem:[#allocation3 + $0xa0] sm:$0xff] }
  0x34   :  { %v326_v44 = vadd.f32 %v325_v39, %v262_v33  ;;  %v272_v19 = vmul.f32 %v208_v8, %v208_v8  ;;  %v211_v23 = vsub.f32 %v83_v16, %v147_v17  ;;  %v273_v24 = vmul.f32 %v209_v13, %v209_v13  ;;  %v149_v27 = vld [vmem:[#allocation6 + $0xa0] sm:$0xff]  ;;  %v86_v31 = vld [vmem:[#allocation3 + $0xa8] sm:$0xff]  ;;  %v87_v36 = vld [vmem:[#allocation3 + $0xb0] sm:$0xff] }
  0x35   :  { %v212_v28 = vsub.f32 %v84_v21, %v148_v22  ;;  %v274_v29 = vmul.f32 %v210_v18, %v210_v18  ;;  %v150_v32 = vld [vmem:[#allocation6 + $0xa8] sm:$0xff]  ;;  %v213_v33 = vsub.f32 %v85_v26, %v149_v27  ;;  %v151_v37 = vld [vmem:[#allocation6 + $0xb0] sm:$0xff]  ;;  %v88_v41 = vld [vmem:[#allocation3 + $0xb8] sm:$0xff] }
  0x36   :  { %v327_v49 = vadd.f32 %v326_v44, %v263_v38  ;;  %v275_v34 = vmul.f32 %v211_v23, %v211_v23  ;;  %v214_v38 = vsub.f32 %v86_v31, %v150_v32  ;;  %v152_v42 = vld [vmem:[#allocation6 + $0xb8] sm:$0xff]  ;;  %v89_v46 = vld [vmem:[#allocation3 + $0xc0] sm:$0xff]  ;;  %v90_v51 = vld [vmem:[#allocation3 + $0xc8] sm:$0xff] }
  0x37   :  { %v276_v39 = vmul.f32 %v212_v28, %v212_v28  ;;  %v277_v44 = vmul.f32 %v213_v33, %v213_v33  ;;  %v153_v47 = vld [vmem:[#allocation6 + $0xc0] sm:$0xff]  ;;  %v154_v52 = vld [vmem:[#allocation6 + $0xc8] sm:$0xff]  ;;  %v91_v56 = vld [vmem:[#allocation3 + $0xd0] sm:$0xff] }
  0x38   :  { %v328_v54 = vadd.f32 %v327_v49, %v264_v43  ;;  %v215_v43 = vsub.f32 %v87_v36, %v151_v37  ;;  %v278_v49 = vmul.f32 %v214_v38, %v214_v38  ;;  %v155_v57 = vld [vmem:[#allocation6 + $0xd0] sm:$0xff]  ;;  %v92_v61 = vld [vmem:[#allocation3 + $0xd8] sm:$0xff]  ;;  %v93_v2 = vld [vmem:[#allocation3 + $0xe0] sm:$0xff] }
  0x39   :  { %v156_v62 = vld [vmem:[#allocation6 + $0xd8] sm:$0xff]  ;;  %v157_v3 = vld [vmem:[#allocation6 + $0xe0] sm:$0xff]  ;;  %v94_v7 = vld [vmem:[#allocation3 + $0xe8] sm:$0xff] }
  0x3a   :  { %v329_v59 = vadd.f32 %v328_v54, %v265_v48  ;;  %v216_v48 = vsub.f32 %v88_v41, %v152_v42  ;;  %v279_v54 = vmul.f32 %v215_v43, %v215_v43  ;;  %v158_v8 = vld [vmem:[#allocation6 + $0xe8] sm:$0xff]  ;;  %v95_v12 = vld [vmem:[#allocation3 + $0xf0] sm:$0xff]  ;;  %v96_v17 = vld [vmem:[#allocation3 + $0xf8] sm:$0xff] }
  0x3b   :  { %v159_v13 = vld [vmem:[#allocation6 + $0xf0] sm:$0xff]  ;;  %v160_v18 = vld [vmem:[#allocation6 + $0xf8] sm:$0xff]  ;;  %v97_v22 = vld [vmem:[#allocation3 + $0x100] sm:$0xff] }
  0x3c   :  { %v330_v0 = vadd.f32 %v329_v59, %v266_v53  ;;  %v217_v53 = vsub.f32 %v89_v46, %v153_v47  ;;  %v280_v59 = vmul.f32 %v216_v48, %v216_v48  ;;  %v161_v23 = vld [vmem:[#allocation6 + $0x100] sm:$0xff]  ;;  %v98_v27 = vld [vmem:[#allocation3 + $0x108] sm:$0xff]  ;;  %v99_v32 = vld [vmem:[#allocation3 + $0x110] sm:$0xff] }
  0x3d   :  { %v162_v28 = vld [vmem:[#allocation6 + $0x108] sm:$0xff]  ;;  %v163_v33 = vld [vmem:[#allocation6 + $0x110] sm:$0xff]  ;;  %v100_v37 = vld [vmem:[#allocation3 + $0x118] sm:$0xff] }
  0x3e   :  { %v331_v5 = vadd.f32 %v330_v0, %v267_v58  ;;  %v218_v58 = vsub.f32 %v90_v51, %v154_v52  ;;  %v281_v0 = vmul.f32 %v217_v53, %v217_v53  ;;  %v164_v38 = vld [vmem:[#allocation6 + $0x118] sm:$0xff]  ;;  %v101_v42 = vld [vmem:[#allocation3 + $0x120] sm:$0xff]  ;;  %v102_v47 = vld [vmem:[#allocation3 + $0x128] sm:$0xff] }
  0x3f   :  { %v165_v43 = vld [vmem:[#allocation6 + $0x120] sm:$0xff]  ;;  %v166_v48 = vld [vmem:[#allocation6 + $0x128] sm:$0xff]  ;;  %v103_v52 = vld [vmem:[#allocation3 + $0x130] sm:$0xff] }
  0x40   :  { %v332_v10 = vadd.f32 %v331_v5, %v268_v63  ;;  %v219_v63 = vsub.f32 %v91_v56, %v155_v57  ;;  %v282_v5 = vmul.f32 %v218_v58, %v218_v58  ;;  %v167_v53 = vld [vmem:[#allocation6 + $0x130] sm:$0xff]  ;;  %v104_v57 = vld [vmem:[#allocation3 + $0x138] sm:$0xff] }
  0x41   :  { %v168_v58 = vld [vmem:[#allocation6 + $0x138] sm:$0xff] }
  0x42   :  { %v333_v15 = vadd.f32 %v332_v10, %v269_v4  ;;  %v220_v4 = vsub.f32 %v92_v61, %v156_v62  ;;  %v283_v10 = vmul.f32 %v219_v63, %v219_v63  ;;  %v105_v62 = vld [vmem:[#allocation3 + $0x140] sm:$0xff] }
  0x43   :  { %v169_v63 = vld [vmem:[#allocation6 + $0x140] sm:$0xff] }
  0x44   :  { %v334_v20 = vadd.f32 %v333_v15, %v270_v9  ;;  %v221_v9 = vsub.f32 %v93_v2, %v157_v3  ;;  %v284_v15 = vmul.f32 %v220_v4, %v220_v4  ;;  %v106_v3 = vld [vmem:[#allocation3 + $0x148] sm:$0xff] }
  0x45   :  { %v170_v4 = vld [vmem:[#allocation6 + $0x148] sm:$0xff] }
  0x46   :  { %v335_v25 = vadd.f32 %v334_v20, %v271_v14  ;;  %v222_v14 = vsub.f32 %v94_v7, %v158_v8  ;;  %v285_v20 = vmul.f32 %v221_v9, %v221_v9  ;;  %v107_v8 = vld [vmem:[#allocation3 + $0x150] sm:$0xff] }
  0x47   :  { %v171_v9 = vld [vmem:[#allocation6 + $0x150] sm:$0xff] }
  0x48   :  { %v336_v30 = vadd.f32 %v335_v25, %v272_v19  ;;  %v223_v19 = vsub.f32 %v95_v12, %v159_v13  ;;  %v286_v25 = vmul.f32 %v222_v14, %v222_v14  ;;  %v108_v13 = vld [vmem:[#allocation3 + $0x158] sm:$0xff] }
  0x49   :  { %v172_v14 = vld [vmem:[#allocation6 + $0x158] sm:$0xff] }
  0x4a   :  { %v337_v35 = vadd.f32 %v336_v30, %v273_v24  ;;  %v224_v24 = vsub.f32 %v96_v17, %v160_v18  ;;  %v287_v30 = vmul.f32 %v223_v19, %v223_v19  ;;  %v109_v18 = vld [vmem:[#allocation3 + $0x160] sm:$0xff] }
  0x4b   :  { %v173_v19 = vld [vmem:[#allocation6 + $0x160] sm:$0xff] }
  0x4c   :  { %v338_v40 = vadd.f32 %v337_v35, %v274_v29  ;;  %v225_v29 = vsub.f32 %v97_v22, %v161_v23  ;;  %v288_v35 = vmul.f32 %v224_v24, %v224_v24  ;;  %v110_v23 = vld [vmem:[#allocation3 + $0x168] sm:$0xff] }
  0x4d   :  { %v174_v24 = vld [vmem:[#allocation6 + $0x168] sm:$0xff] }
  0x4e   :  { %v339_v45 = vadd.f32 %v338_v40, %v275_v34  ;;  %v226_v34 = vsub.f32 %v98_v27, %v162_v28  ;;  %v289_v40 = vmul.f32 %v225_v29, %v225_v29  ;;  %v111_v28 = vld [vmem:[#allocation3 + $0x170] sm:$0xff] }
  0x4f   :  { %v175_v29 = vld [vmem:[#allocation6 + $0x170] sm:$0xff] }
  0x50   :  { %v340_v50 = vadd.f32 %v339_v45, %v276_v39  ;;  %v227_v39 = vsub.f32 %v99_v32, %v163_v33  ;;  %v290_v45 = vmul.f32 %v226_v34, %v226_v34  ;;  %v112_v33 = vld [vmem:[#allocation3 + $0x178] sm:$0xff] }
  0x51   :  { %v176_v34 = vld [vmem:[#allocation6 + $0x178] sm:$0xff] }
  0x52   :  { %v341_v55 = vadd.f32 %v340_v50, %v277_v44  ;;  %v228_v44 = vsub.f32 %v100_v37, %v164_v38  ;;  %v291_v50 = vmul.f32 %v227_v39, %v227_v39  ;;  %v113_v38 = vld [vmem:[#allocation3 + $0x180] sm:$0xff] }
  0x53   :  { %v177_v39 = vld [vmem:[#allocation6 + $0x180] sm:$0xff] }
  0x54   :  { %v342_v60 = vadd.f32 %v341_v55, %v278_v49  ;;  %v229_v49 = vsub.f32 %v101_v42, %v165_v43  ;;  %v292_v55 = vmul.f32 %v228_v44, %v228_v44  ;;  %v114_v43 = vld [vmem:[#allocation3 + $0x188] sm:$0xff] }
  0x55   :  { %v178_v44 = vld [vmem:[#allocation6 + $0x188] sm:$0xff] }
  0x56   :  { %v343_v1 = vadd.f32 %v342_v60, %v279_v54  ;;  %v230_v54 = vsub.f32 %v102_v47, %v166_v48  ;;  %v293_v60 = vmul.f32 %v229_v49, %v229_v49  ;;  %v115_v48 = vld [vmem:[#allocation3 + $0x190] sm:$0xff] }
  0x57   :  { %v179_v49 = vld [vmem:[#allocation6 + $0x190] sm:$0xff] }
  0x58   :  { %v344_v6 = vadd.f32 %v343_v1, %v280_v59  ;;  %v231_v59 = vsub.f32 %v103_v52, %v167_v53  ;;  %v294_v1 = vmul.f32 %v230_v54, %v230_v54  ;;  %v116_v53 = vld [vmem:[#allocation3 + $0x198] sm:$0xff] }
  0x59   :  { %v180_v54 = vld [vmem:[#allocation6 + $0x198] sm:$0xff] }
  0x5a   :  { %v345_v11 = vadd.f32 %v344_v6, %v281_v0  ;;  %v232_v0 = vsub.f32 %v104_v57, %v168_v58  ;;  %v295_v6 = vmul.f32 %v231_v59, %v231_v59  ;;  %v117_v58 = vld [vmem:[#allocation3 + $0x1a0] sm:$0xff] }
  0x5b   :  { %v181_v59 = vld [vmem:[#allocation6 + $0x1a0] sm:$0xff] }
  0x5c   :  { %v346_v16 = vadd.f32 %v345_v11, %v282_v5  ;;  %v233_v5 = vsub.f32 %v105_v62, %v169_v63  ;;  %v296_v11 = vmul.f32 %v232_v0, %v232_v0  ;;  %v118_v63 = vld [vmem:[#allocation3 + $0x1a8] sm:$0xff] }
  0x5d   :  { %v182_v0 = vld [vmem:[#allocation6 + $0x1a8] sm:$0xff] }
  0x5e   :  { %v347_v21 = vadd.f32 %v346_v16, %v283_v10  ;;  %v234_v10 = vsub.f32 %v106_v3, %v170_v4  ;;  %v297_v16 = vmul.f32 %v233_v5, %v233_v5  ;;  %v119_v4 = vld [vmem:[#allocation3 + $0x1b0] sm:$0xff] }
  0x5f   :  { %v183_v5 = vld [vmem:[#allocation6 + $0x1b0] sm:$0xff] }
  0x60   :  { %v348_v26 = vadd.f32 %v347_v21, %v284_v15  ;;  %v235_v15 = vsub.f32 %v107_v8, %v171_v9  ;;  %v298_v21 = vmul.f32 %v234_v10, %v234_v10  ;;  %v120_v9 = vld [vmem:[#allocation3 + $0x1b8] sm:$0xff] }
  0x61   :  { %v184_v10 = vld [vmem:[#allocation6 + $0x1b8] sm:$0xff] }
  0x62   :  { %v349_v31 = vadd.f32 %v348_v26, %v285_v20  ;;  %v236_v20 = vsub.f32 %v108_v13, %v172_v14  ;;  %v299_v26 = vmul.f32 %v235_v15, %v235_v15  ;;  %v121_v14 = vld [vmem:[#allocation3 + $0x1c0] sm:$0xff] }
  0x63   :  { %v185_v15 = vld [vmem:[#allocation6 + $0x1c0] sm:$0xff] }
  0x64   :  { %v350_v36 = vadd.f32 %v349_v31, %v286_v25  ;;  %v237_v25 = vsub.f32 %v109_v18, %v173_v19  ;;  %v300_v31 = vmul.f32 %v236_v20, %v236_v20  ;;  %v122_v19 = vld [vmem:[#allocation3 + $0x1c8] sm:$0xff] }
  0x65   :  { %v186_v20 = vld [vmem:[#allocation6 + $0x1c8] sm:$0xff] }
  0x66   :  { %v351_v41 = vadd.f32 %v350_v36, %v287_v30  ;;  %v238_v30 = vsub.f32 %v110_v23, %v174_v24  ;;  %v301_v36 = vmul.f32 %v237_v25, %v237_v25  ;;  %v123_v24 = vld [vmem:[#allocation3 + $0x1d0] sm:$0xff] }
  0x67   :  { %v187_v25 = vld [vmem:[#allocation6 + $0x1d0] sm:$0xff] }
  0x68   :  { %v352_v46 = vadd.f32 %v351_v41, %v288_v35  ;;  %v239_v35 = vsub.f32 %v111_v28, %v175_v29  ;;  %v302_v41 = vmul.f32 %v238_v30, %v238_v30  ;;  %v124_v29 = vld [vmem:[#allocation3 + $0x1d8] sm:$0xff] }
  0x69   :  { %v188_v30 = vld [vmem:[#allocation6 + $0x1d8] sm:$0xff] }
  0x6a   :  { %v353_v51 = vadd.f32 %v352_v46, %v289_v40  ;;  %v240_v40 = vsub.f32 %v112_v33, %v176_v34  ;;  %v303_v46 = vmul.f32 %v239_v35, %v239_v35  ;;  %v125_v34 = vld [vmem:[#allocation3 + $0x1e0] sm:$0xff] }
  0x6b   :  { %v189_v35 = vld [vmem:[#allocation6 + $0x1e0] sm:$0xff] }
  0x6c   :  { %v354_v56 = vadd.f32 %v353_v51, %v290_v45  ;;  %v241_v45 = vsub.f32 %v113_v38, %v177_v39  ;;  %v304_v51 = vmul.f32 %v240_v40, %v240_v40  ;;  %v126_v39 = vld [vmem:[#allocation3 + $0x1e8] sm:$0xff] }
  0x6d   :  { %v190_v40 = vld [vmem:[#allocation6 + $0x1e8] sm:$0xff] }
  0x6e   :  { %v355_v61 = vadd.f32 %v354_v56, %v291_v50  ;;  %v242_v50 = vsub.f32 %v114_v43, %v178_v44  ;;  %v305_v56 = vmul.f32 %v241_v45, %v241_v45  ;;  %v127_v44 = vld [vmem:[#allocation3 + $0x1f0] sm:$0xff] }
  0x6f   :  { %v191_v45 = vld [vmem:[#allocation6 + $0x1f0] sm:$0xff] }
  0x70   :  { %v356_v2 = vadd.f32 %v355_v61, %v292_v55  ;;  %v243_v55 = vsub.f32 %v115_v48, %v179_v49  ;;  %v306_v61 = vmul.f32 %v242_v50, %v242_v50  ;;  %v128_v49 = vld [vmem:[#allocation3 + $0x1f8] sm:$0xff] }
  0x71   :  { %v192_v50 = vld [vmem:[#allocation6 + $0x1f8] sm:$0xff] }
  0x72   :  { %v357_v7 = vadd.f32 %v356_v2, %v293_v60  ;;  %v244_v60 = vsub.f32 %v116_v53, %v180_v54  ;;  %v307_v2 = vmul.f32 %v243_v55, %v243_v55  ;;  %v256_v54 = vsub.f32 %v128_v49, %v192_v50 }
  0x74   :  { %v358_v12 = vadd.f32 %v357_v7, %v294_v1  ;;  %v245_v1 = vsub.f32 %v117_v58, %v181_v59  ;;  %v308_v7 = vmul.f32 %v244_v60, %v244_v60  ;;  %v320_v59 = vmul.f32 %v256_v54, %v256_v54 }
  0x76   :  { %v359_v17 = vadd.f32 %v358_v12, %v295_v6  ;;  %v246_v6 = vsub.f32 %v118_v63, %v182_v0  ;;  %v309_v12 = vmul.f32 %v245_v1, %v245_v1 }
  0x78   :  { %v360_v22 = vadd.f32 %v359_v17, %v296_v11  ;;  %v247_v11 = vsub.f32 %v119_v4, %v183_v5  ;;  %v310_v17 = vmul.f32 %v246_v6, %v246_v6 }
  0x7a   :  { %v361_v27 = vadd.f32 %v360_v22, %v297_v16  ;;  %v248_v16 = vsub.f32 %v120_v9, %v184_v10  ;;  %v311_v22 = vmul.f32 %v247_v11, %v247_v11 }
  0x7c   :  { %v362_v32 = vadd.f32 %v361_v27, %v298_v21  ;;  %v249_v21 = vsub.f32 %v121_v14, %v185_v15  ;;  %v312_v27 = vmul.f32 %v248_v16, %v248_v16 }
  0x7e   :  { %v363_v37 = vadd.f32 %v362_v32, %v299_v26  ;;  %v250_v26 = vsub.f32 %v122_v19, %v186_v20  ;;  %v313_v32 = vmul.f32 %v249_v21, %v249_v21 }
  0x80   :  { %v364_v42 = vadd.f32 %v363_v37, %v300_v31  ;;  %v251_v31 = vsub.f32 %v123_v24, %v187_v25  ;;  %v314_v37 = vmul.f32 %v250_v26, %v250_v26 }
  0x82   :  { %v365_v47 = vadd.f32 %v364_v42, %v301_v36  ;;  %v252_v36 = vsub.f32 %v124_v29, %v188_v30  ;;  %v315_v42 = vmul.f32 %v251_v31, %v251_v31 }
  0x84   :  { %v366_v52 = vadd.f32 %v365_v47, %v302_v41  ;;  %v253_v41 = vsub.f32 %v125_v34, %v189_v35  ;;  %v316_v47 = vmul.f32 %v252_v36, %v252_v36 }
  0x86   :  { %v367_v57 = vadd.f32 %v366_v52, %v303_v46  ;;  %v254_v46 = vsub.f32 %v126_v39, %v190_v40  ;;  %v317_v52 = vmul.f32 %v253_v41, %v253_v41 }
  0x88   :  { %v368_v62 = vadd.f32 %v367_v57, %v304_v51  ;;  %v255_v51 = vsub.f32 %v127_v44, %v191_v45  ;;  %v318_v55 = vmul.f32 %v254_v46, %v254_v46 }
  0x8a   :  { %v369_v3 = vadd.f32 %v368_v62, %v305_v56  ;;  %v319_v57 = vmul.f32 %v255_v51, %v255_v51 }
  0x8c   :  { %v370_v8 = vadd.f32 %v369_v3, %v306_v61 }
  0x8e   :  { %v371_v13 = vadd.f32 %v370_v8, %v307_v2 }
  0x90   :  { %v372_v18 = vadd.f32 %v371_v13, %v308_v7 }
  0x92   :  { %v373_v23 = vadd.f32 %v372_v18, %v309_v12 }
  0x94   :  { %v374_v28 = vadd.f32 %v373_v23, %v310_v17 }
  0x96   :  { %v375_v33 = vadd.f32 %v374_v28, %v311_v22 }
  0x98   :  { %v376_v38 = vadd.f32 %v375_v33, %v312_v27 }
  0x9a   :  { %v377_v43 = vadd.f32 %v376_v38, %v313_v32 }
  0x9c   :  { %v378_v48 = vadd.f32 %v377_v43, %v314_v37 }
  0x9e   :  { %v379_v53 = vadd.f32 %v378_v48, %v315_v42 }
  0xa0   :  { %v380_v56 = vadd.f32 %v379_v53, %v316_v47 }
  0xa2   :  { %v381_v58 = vadd.f32 %v380_v56, %v317_v52 }
  0xa4   :  { %v382_v60 = vadd.f32 %v381_v58, %v318_v55 }
  0xa6   :  { %v383_v61 = vadd.f32 %v382_v60, %v319_v57 }
  0xa8   :  { %v384_v62 = vadd.f32 %v383_v61, %v320_v59 }
  0xaa   :  { %391 = vadd.xlane.f32.xlu0 %v384_v62 }
 0x137   :  { %v392_v63 = vpop.xlane.xlu0 %391 }
 0x138   :  { %v393_v0 = vrot.slane %v392_v63, 4 }
 0x13a   :  { %v394_v1 = vadd.f32 %v393_v0, %v392_v63 }
 0x13c   :  { %v395_v2 = vrot.slane %v394_v1, 2 }
 0x13e   :  { %v396_v3 = vadd.f32 %v395_v2, %v394_v1 }
 0x140   :  { %v397_v4 = vrot.slane %v396_v3, 1 }
 0x142   :  { %v398_v5 = vadd.f32 %v397_v4, %v396_v3 }
 0x144   :  { %421 = vpush %v398_v5 }
 0x175   :  { %s422_s1 = spop %421 }
 0x176   :  { %401 = sst [smem:[#allocation8]] %s422_s1 }
 0x177   :  { %481 = shalt.err (!%p478_p4)
}
 0x178   :  { %s492_s13 = smov [#allocation8]  }
 0x179   :  { %409 = dma.smem_to_hbm %s492_s13, 16, %s546_s2, [#allocation5]  }
 0x17a   :  { %486 = dma.done.wait [#allocation5], 16  }
 0x17b   :  { %487 = vsyncadd [#allocation5], 4294967280 }
 0x17c   :  { %413 = sfence }
 0x17d   :  { %414 = vsyncpa [#allocation4], 1 }
 0x17e   :  { %415 = vsyncpa [#allocation7], 1 }
 0x17f   :  { %416 = vsyncpa [#allocation5], 1 }

</bundles_post_ra>
